<compile_context>
chip_gen: v7x
topology: tpu7x:2x2x1
jax: 0.10.0
libtpu: 0.0.40
codegen_flags: <defaults>
</compile_context>

<pallas_src>
import functools

import numpy as np
import jax
import jax.numpy as jnp
from jax.experimental import pallas as pl
from jax.experimental.pallas import tpu as pltpu


# ----------------------------------------------------------------------------
# Parameter construction (host-side numpy glue — mirrors SINCOS.__init__ exactly,
# including the float64 omega math before torch's .float() cast).
# ----------------------------------------------------------------------------
def _get_1d_sincos_pos_embed_from_grid(embed_dim, pos):
    assert embed_dim % 2 == 0
    omega = np.arange(embed_dim // 2, dtype=np.float64)
    omega /= embed_dim / 2.0
    omega = 1.0 / 10000 ** omega
    pos = pos.reshape(-1)
    out = np.einsum("m,d->md", pos, omega)
    emb_sin = np.sin(out)
    emb_cos = np.cos(out)
    return np.concatenate([emb_sin, emb_cos], axis=1)


def _get_2d_sincos_pos_embed_from_grid(embed_dim, grid):
    assert embed_dim % 2 == 0
    emb_h = _get_1d_sincos_pos_embed_from_grid(embed_dim // 2, grid[0])
    emb_w = _get_1d_sincos_pos_embed_from_grid(embed_dim // 2, grid[1])
    return np.concatenate([emb_h, emb_w], axis=1)


def get_2d_sincos_pos_embed(embed_dim, grid_size, cls_token=False):
    grid_h = np.arange(grid_size, dtype=np.float32)
    grid_w = np.arange(grid_size, dtype=np.float32)
    grid = np.meshgrid(grid_w, grid_h)
    grid = np.stack(grid, axis=0)
    grid = grid.reshape([2, 1, grid_size, grid_size])
    pos_embed = _get_2d_sincos_pos_embed_from_grid(embed_dim, grid)
    if cls_token:
        pos_embed = np.concatenate([np.zeros([1, embed_dim]), pos_embed], axis=0)
    return pos_embed  # (grid_size*grid_size, embed_dim), float64


# ----------------------------------------------------------------------------
# Pallas kernel: lane-dense 2D elementwise add with in-kernel pos broadcast.
# ----------------------------------------------------------------------------
def _add_bcast_kernel(x_ref, pos_ref, o_ref, *, reps):
    # x_ref, o_ref : (tb, thw*C)   pos_ref : (tb, C)
    # Flattened lane index k = spatial*C + c, so the matching pos value is
    # pos[b, k % C] == tile(pos, (1, reps))[b, k]. The tile is VPU/XLU work that
    # hides under the block DMAs (much cheaper than materializing it in HBM).
    o_ref[...] = x_ref[...] + jnp.tile(pos_ref[...], (1, reps))


# ----------------------------------------------------------------------------
# Tiling / VMEM configuration.
# ----------------------------------------------------------------------------
def _vmem_config():
    """Generation-aware (vmem_limit_bytes, per-block byte budget).

    Two block-sized arrays (x in, out) x 2 pipeline buffers => 4 x block bytes of
    VMEM, kept at <= half of the scoped limit for headroom (pos blocks are tiny).
    """
    try:
        vmem = int(pltpu.get_tpu_info().vmem_capacity_bytes)
    except Exception:
        vmem = 64 << 20  # conservative fallback (v7x-sized)
    vmem_limit = min(64 << 20, max(32 << 20, vmem // 2))  # 64 MiB v5e/v6e, 32 MiB v7x
    budget = max(1 << 20, vmem_limit // 8)                # 8 MiB v5e/v6e, 4 MiB v7x
    return vmem_limit, budget


def _choose_tiles(B, hw, C, itemsize, budget_bytes, min_steps=8):
    """Pick (tb, thw): rows per block and spatial positions per lane block.

    Constraints:
      * tb divides B and is a multiple of 8 (or tb == B)          -> (8,.) rule
      * thw divides hw and thw*C is a multiple of 128 (or thw==hw) -> (.,128) rule,
        and whole-C granularity keeps the in-kernel pos tile aligned.
    Preference: fit the byte budget, reach >= min_steps grid steps (pipelining +
    v7x dual-core sharding), then maximize block size (amortize per-step overhead).
    """
    row_tiles = sorted({B} | {d for d in range(8, B + 1, 8) if B % d == 0},
                       reverse=True)
    lane_tiles = sorted({hw} | {d for d in range(1, hw + 1)
                                if hw % d == 0 and (d * C) % 128 == 0},
                        reverse=True)
    cands = []
    for tb in row_tiles:
        for thw in lane_tiles:
            blk = tb * thw * C * itemsize
            steps = (B // tb) * (hw // thw)
            cands.append((tb, thw, blk, steps))

    fitting = [c for c in cands if c[2] <= budget_bytes]
    # TODO(synk): if nothing fits (e.g. prime hw with tiny C), fall back to the
    # smallest candidate; finer-than-C lane splits would need a lane index_map on pos.
    pool = fitting if fitting else [min(cands, key=lambda c: c[2])]
    pipelined = [c for c in pool if c[3] >= min_steps]
    pool = pipelined if pipelined else pool
    tb, thw, _, _ = max(pool, key=lambda c: c[2])
    return tb, thw


# ----------------------------------------------------------------------------
# Forward wrapper.
# ----------------------------------------------------------------------------
def sincos_forward(x, pos_embed, *, donate_x=False):
    """x: (B, H, W, C), pos_embed: (B, C) -> (B, H, W, C); out = x + pos[:,None,None,:]."""
    B, H, W, C = x.shape
    assert pos_embed.shape == (B, C), (
        "Forward semantics require B == grid_size**2 and C == embed_dim"
    )
    hw = H * W
    n = hw * C
    itemsize = jnp.dtype(x.dtype).itemsize

    vmem_limit, budget = _vmem_config()
    tb, thw = _choose_tiles(B, hw, C, itemsize, budget)
    tn = thw * C

    x2 = x.reshape(B, n)                       # contiguous, free view
    pos2 = pos_embed.astype(x.dtype)           # tiny (B, C); broadcast happens in-kernel

    grid = (B // tb, n // tn)                  # lanes innermost -> pos block re-fetch elided
    kernel = functools.partial(_add_bcast_kernel, reps=thw)

    out = pl.pallas_call(
        kernel,
        out_shape=jax.ShapeDtypeStruct((B, n), x.dtype),
        grid=grid,
        in_specs=[
            pl.BlockSpec((tb, tn), lambda i, j: (i, j)),   # x block (lane-dense)
            pl.BlockSpec((tb, C), lambda i, j: (i, 0)),    # small pos block
        ],
        out_specs=pl.BlockSpec((tb, tn), lambda i, j: (i, j)),
        compiler_params=pltpu.CompilerParams(
            dimension_semantics=("parallel", "parallel"),
            vmem_limit_bytes=vmem_limit,
        ),
        input_output_aliases=({0: 0} if donate_x else {}),
    )(x2, pos2)
    return out.reshape(B, H, W, C)


if __name__ == "__main__":
    # Small config consistent with the module: grid_size=8 -> B=64 rows in pos_embed,
    # embed_dim=32 (divisible by 4), small spatial H=W=4.
    embed_dim = 32
    grid_size = 8
    H = W = 4
    B = grid_size * grid_size

    pos_embed_np = get_2d_sincos_pos_embed(embed_dim, grid_size)   # (64, 32) float64
    pos_embed = jnp.asarray(pos_embed_np, dtype=jnp.float32)       # torch .float()

    key = jax.random.PRNGKey(0)
    x = jax.random.normal(key, (B, H, W, embed_dim), dtype=jnp.float32)

    out = jax.block_until_ready(sincos_forward(x, pos_embed))

    # Reference (pure JAX) check of the broadcast-add semantics.
    ref = x + pos_embed[:, None, None, :]
    np.testing.assert_allclose(np.asarray(out), np.asarray(ref), rtol=1e-6, atol=1e-6)

    print("KERNEL_OK")
</pallas_src>

<mosaic_0001>
module attributes {stable_mosaic.version = 11 : i64} {
  func.func @_add_bcast_kernel(%arg0: i32, %arg1: i32, %arg2: memref<32x128xf32, #tpu.memory_space<vmem>>, %arg3: memref<32x32xf32, #tpu.memory_space<vmem>>, %arg4: memref<32x128xf32, #tpu.memory_space<vmem>>) attributes {dimension_semantics = [#tpu.dimension_semantics<parallel>, #tpu.dimension_semantics<parallel>], iteration_bounds = array<i64: 2, 4>, scalar_prefetch = 0 : i64, scratch_operands = 0 : i64, tpu.core_type = #tpu.core_type<tc>, window_params = [{transform_indices = @transform_0, window_bounds = array<i64: 32, 128>}, {transform_indices = @transform_1, window_bounds = array<i64: 32, 32>}, {transform_indices = @transform_2, window_bounds = array<i64: 32, 128>}]} {
    %c0 = arith.constant 0 : index
    %c0_0 = arith.constant 0 : index
    %0 = vector.load %arg2[%c0, %c0_0] : memref<32x128xf32, #tpu.memory_space<vmem>>, vector<32x128xf32>
    %c0_1 = arith.constant 0 : index
    %c0_2 = arith.constant 0 : index
    %1 = vector.load %arg3[%c0_1, %c0_2] : memref<32x32xf32, #tpu.memory_space<vmem>>, vector<32x32xf32>
    %2 = tpu.concatenate %1, %1, %1, %1 in 1 : vector<32x32xf32>, vector<32x32xf32>, vector<32x32xf32>, vector<32x32xf32> -> vector<32x128xf32>
    %3 = arith.addf %0, %2 : vector<32x128xf32>
    %c0_3 = arith.constant 0 : index
    %c0_4 = arith.constant 0 : index
    %4 = vector.load %arg4[%c0_3, %c0_4] : memref<32x128xf32, #tpu.memory_space<vmem>>, vector<32x128xf32>
    tpu.vector_store %arg4[%c0_3, %c0_4], %3 {strides = array<i32>} : memref<32x128xf32, #tpu.memory_space<vmem>>, vector<32x128xf32>,
    return
  }
  func.func @transform_0(%arg0: i32, %arg1: i32) -> (i32, i32) {
    %c0_i32 = arith.constant 0 : i32
    return %arg0, %arg1 : i32, i32
  }
  func.func @transform_1(%arg0: i32, %arg1: i32) -> (i32, i32) {
    %c0_i32 = arith.constant 0 : i32
    %c0_i32_0 = arith.constant 0 : i32
    return %arg0, %c0_i32 : i32, i32
  }
  func.func @transform_2(%arg0: i32, %arg1: i32) -> (i32, i32) {
    %c0_i32 = arith.constant 0 : i32
    return %arg0, %arg1 : i32, i32
  }
}

</mosaic_0001>

<bundles_post_ra>
// kernel: tpu_custom_call.1
= control target key start
LH: loop header
LB: loop body
LE: loop exit
PB: predicated region body
PF: predicated region fallthrough
CT: control target
= control target key end

     0   :  { %7 = vsyncpa [#allocation3], 0  ;;  %s876_s0 = inlined_call_operand.hbm [shape: f32[64,512], index: 0, kind: input, shape index: {}]   ;;  %s877_s1 = inlined_call_operand.vmem [shape: f32[64,32], index: 1, kind: input, shape index: {}]   ;;  %s878_s2 = inlined_call_operand.hbm [shape: f32[64,512], index: 2, kind: output, shape index: {}]  }
   0x1   :  { %9 = vsyncpa [#allocation3 + $0x1], 0 }
   0x2   :  { %10 = vsyncpa [#allocation4], 0 }
   0x3   :  { %12 = vsyncpa [#allocation4 + $0x1], 0  ;;  %s655_s9 = smov 0   ;;  %s657_s10 = smov 0  }
   0x4   :  { %s659_s11 = smov 0   ;;  %s661_s12 = smov 0  }
   0x5   :  { %s663_s13 = smov 0   ;;  %s665_s14 = smov 0  }
   0x6   :  { %s667_s15 = smov 0   ;;  %s669_s16 = smov 0  }
   0x7 LB: > { %s391_s17 = sadd.s32 4294967295, %s627_s16   ;;  %s392_s18 = sadd.s32 4294967294, %s627_s16   ;;  %s627_s16 = sphi %s669_s16, %s18_s16   ;;  %s623_s15 = sphi %s667_s15, %s893_s15   ;;  %s619_s14 = sphi %s665_s14, %s892_s14   ;;  %s615_s13 = sphi %s663_s13, %s891_s13   ;;  %s611_s12 = sphi %s661_s12, %s890_s12   ;;  %s607_s11 = sphi %s659_s11, %s889_s11   ;;  %s603_s10 = sphi %s657_s10, %s888_s10   ;;  %s599_s9 = sphi %s655_s9, %s887_s9  }
   0x8   : > { %s27_s19 = sadd.s32 1, %s619_s14  ;;  %s30_s20 = sadd.s32 1, %s623_s15 }
   0x9   : > { %p28_p0 = scmp.ge.s32.totalorder %s27_s19, 4  ;;  %s39_s21 = sadd.s32 1, %s607_s11 }
   0xa   : > { %p46_p1 = scmp.ne.s32.totalorder %s607_s11, %s603_s10  ;;  %p47_p2 = scmp.eq.s32.totalorder %s627_s16, 0 }
   0xb   : > { %s895_s19 = smov (%p28_p0, %s27_s19), 0  ;;  %s897_s20 = smov (!%p28_p0, %s30_s20), %s623_s15 }
   0xc   : > { %s35_s22 = ssub.s32 %s619_s14, %s895_s19  ;;  %p708_p3 = por %p47_p2, %p46_p1 }
   0xd   : > { %p32_p4 = scmp.ge.s32.totalorder %s897_s20, 2  ;;  %p52_p5 = scmp.ne.s32.totalorder %s603_s10, %s599_s9 }
   0xe   : > { %p53_p6 = scmp.eq.s32.totalorder %s391_s17, 0  ;;  %p104_p7 = scmp.eq.s32.totalorder %s391_s17, 7 }
   0xf   : > { %s899_s20 = smov (%p32_p4, %s897_s20), 0  ;;  %p110_p10 = scmp.eq.s32.totalorder %s392_s18, 7 }
  0x10   : > { %p716_p8 = por %p53_p6, %p52_p5  ;;  %p720_p9 = por %p104_p7, %p46_p1 }
  0x11   : > { %s34_s26 = ssub.s32 %s623_s15, %s899_s20  ;;  %p726_p12 = por %p110_p10, %p52_p5 }
  0x12   : > { %s882_s25 = scalar_select %p720_p9, 1, 0 }
  0x13   : > { %s36_s27 = sor.u32 %s35_s22, %s34_s26  ;;  %p424_p13 = scmp.lt.s32.totalorder %s627_s16, 8 }
  0x14   : > { %p37_p11 = scmp.eq.s32.totalorder %s36_s27, 0  ;;  %s130_s29 = sand.u32 1, %s607_s11  }
  0x15   : > { %s883_s28 = scalar_select %p726_p12, 1, 0 }
  0x16   : > { %s733_s30 = scalar_select %p37_p11, %s607_s11, %s39_s21  }
  0x17   : > { %s395_s3 = sshll.u32 %s130_s29, 5  ;;  %s410_s4 = sshll.u32 %s623_s15, 4 }
  0x18   : > { %s140_s5 = sadd.s32 %s619_s14, %s410_s4  ;;  %s134_s6 = scalar_lea.vmem [#allocation2], %s395_s3 }
  0x19   : > { %s143_s7 = sshll.u32 %s134_s6, 4  ;;  %s398_s8 = sshll.u32 %s140_s5, 7  ;;  %s737_s7 = int_to_ptr.vmem [resolvable:$true] %s143_s7 }
  0x1a   : > { %s742_s22 = scalar_lea.hbm %s876_s0, %s398_s8  ;;  %p746_p0 = pnand %p424_p13, %p708_p3 }
  0x1b   : > { %s750_s26 = scalar_lea.sflag [#allocation3], %s130_s29  ;;  %s499_s27 = scalar_lea.hbm %s742_s22, 512 }
  0x1c   : > { %p500_p1 = scmp.ne.s32.totalorder %s742_s22, %s499_s27  ;;  %p501_p2 = pneg %p746_p0 }
  0x1d   : > { %s504_s4 = scalar_lea.hbm %s876_s0, 4096  ;;  %p505_p3 = scmp.lt.u32.totalorder %s742_s22, %s876_s0 }
  0x1e   : > { %p502_p4 = pnand %p501_p2, %p500_p1  ;;  %p506_p6 = scmp.lt.u32.totalorder %s504_s4, %s499_s27 }
  0x1f   : > { %p508_p10 = scmp.lt.u32.totalorder %s499_s27, %s742_s22 }
  0x20   : > { %p503_p5 = pneg %p502_p4  ;;  %p507_p7 = por %p506_p6, %p505_p3 }
  0x22   : > { %p509_p11 = por %p508_p10, %p507_p7 }
  0x24   : > { %p510_p13 = pnand %p509_p11, %p503_p5 }
  0x26   : > { %513 = shalt.err (!%p510_p13)
}
  0x27   : > { %s514_s29 = scalar_lea.vmem %s737_s7, 512  ;;  %s629_s8 = smov [#allocation2]  }
  0x28   : > { %p515_p1 = scmp.ne.s32.totalorder %s737_s7, %s514_s29  ;;  %s519_s17 = sshll.u32 %s629_s8, 4  ;;  %s520_s17 = int_to_ptr.vmem [resolvable:$false] %s519_s17 }
  0x29   : > { %s521_s18 = scalar_lea.vmem %s520_s17, 1024  ;;  %p522_p9 = scmp.lt.s32.totalorder %s737_s7, %s520_s17 }
  0x2a   : > { %p517_p4 = pnand %p515_p1, %p501_p2  ;;  %p523_p3 = scmp.lt.s32.totalorder %s521_s18, %s514_s29 }
  0x2c   : > { %p518_p12 = pneg %p517_p4  ;;  %p524_p6 = por %p523_p3, %p522_p9 }
  0x2e   : > { %p525_p7 = pnand %p524_p6, %p518_p12 }
  0x30   : > { %528 = shalt.err (!%p525_p7)
}
  0x31   : > { %s630_s27 = smov 512   ;;  %s631_s23 = smov 128  }
  0x32   : > { %s632_s3 = smov 8   ;;  %p399_p2 = scmp.ge.s32.totalorder %s627_s16, 1 }
  0x33   : > { %419 = dma.hbm_to_vmem [thread:$0]  (!%p746_p0), %s742_s22, 512, %s737_s7, %s750_s26, %s630_s27, %s631_s23, %s632_s3  }
  0x34   : > { %p160_p5 = scmp.lt.s32.totalorder %s627_s16, 9 }
  0x36   : > { %p161_p10 = pnand %p399_p2, %p160_p5 }
  0x37   : > { %s781_s4 = sand.u32 (!%p161_p10), 1, %s603_s10  }
  0x38   : > { %164 = sbr.rel (%p161_p10) target bundleno = 225 (0xe1), region = 28  ;;  %s400_s5 = sshll.u32 (!%p161_p10), %s781_s4, 5 }
  0x39   : > { %s167_s6 = scalar_lea.sflag (!%p161_p10), [#allocation3], %s781_s4  ;;  %s787_s29 = scalar_lea.vmem (!%p161_p10), [#allocation2], %s400_s5 }
  0x3f   : > { %590 = dma.done.wait (%p716_p8), %s167_s6, 512  }
  0x40   : > { %592 = vsyncadd (%p716_p8), %s167_s6, 4294966784  ;;  %s402_s7 = sshll.u32 %s615_s13, 2  ;;  %s633_s17 = smov 32   ;;  %vm252_vm0 = vcmask 261120   ;;  %vm257_vm1 = vcmask 523264   ;;  %vm262_vm2 = vcmask 785408  }
  0x41   : > { %p198_p9 = scmp.lt.s32.totalorder %s402_s7, 7  ;;  %s634_s24 = smov 64   ;;  %v205_v14 = vld [vmem:[%s787_s29 + $0x8] sm:$0xff]  ;;  %v204_v15 = vld [vmem:[%s787_s29] sm:$0xff]  ;;  %v207_v26 = vld [vmem:[%s787_s29 + $0x18] sm:$0xff] }
  0x42   : > { %s635_s18 = smov 96   ;;  %s411_s27 = sshll.u32 %s615_s13, 4  ;;  %v206_v27 = vld [vmem:[%s787_s29 + $0x10] sm:$0xff] }
  0x43   : > { %s901_s7 = smov (!%p198_p9, %s402_s7), 7  ;;  %s288_s23 = sadd.s32 %s611_s12, %s411_s27 }
  0x44   : > { %s403_s22 = sshll.u32 %s901_s7, 3  ;;  %s195_s3 = scalar_lea.vmem [#allocation5], %s400_s5 }
  0x45   : > { %s201_s8 = scalar_lea.vmem %s877_s1, %s403_s22  ;;  %s291_s13 = sshll.u32 %s195_s3, 4  ;;  %s815_s13 = int_to_ptr.vmem [resolvable:$true] %s291_s13 }
  0x46   : > { %v210_v0 = vld [vmem:[%s201_s8 + $0x10] sm:$0xff]  ;;  %v208_v1 = vld [vmem:[%s201_s8] sm:$0xff]  ;;  %v211_v2 = vld [vmem:[%s201_s8 + $0x18] sm:$0xff]  ;;  %s407_s6 = sshll.u32 %s288_s23, 7  ;;  %s276_s7 = scalar_lea.sflag [#allocation4], %s781_s4 }
  0x47   : > { %220 = vrot.lane.b32.xlu1 %v210_v0, %s633_s17  ;;  %216 = vrot.lane.b32.xlu0 %v208_v1, %s633_s17  ;;  %v209_v3 = vld [vmem:[%s201_s8 + $0x8] sm:$0xff]  ;;  %s822_s29 = scalar_lea.hbm %s878_s2, %s407_s6  ;;  %s529_s22 = scalar_lea.vmem %s815_s13, 512 }
  0x48   : > { %p530_p8 = scmp.ne.s32.totalorder %s815_s13, %s529_s22  ;;  %p885_p12 = scmp.ne.s32.totalorder %s882_s25, 0 }
  0x49   : > { %s636_s21 = smov [#allocation5]  }
  0x4a   : > { %p531_p0 = pnand %p530_p8, %p885_p12  ;;  %s533_s26 = sshll.u32 %s636_s21, 4  ;;  %s534_s26 = int_to_ptr.vmem [resolvable:$false] %s533_s26 }
  0x4b   : > { %222 = vrot.lane.b32.xlu1 %v211_v2, %s633_s17  ;;  %218 = vrot.lane.b32.xlu0 %v209_v3, %s633_s17  ;;  %s535_s8 = scalar_lea.vmem %s534_s26, 1024  ;;  %p536_p13 = scmp.lt.s32.totalorder %s815_s13, %s534_s26 }
  0x4c   : > { %p532_p11 = pneg %p531_p0  ;;  %p537_p1 = scmp.lt.s32.totalorder %s535_s8, %s529_s22 }
  0x4e   : > { %p538_p4 = por %p537_p1, %p536_p13 }
  0x4f   : > { %230 = vrot.lane.b32.xlu1 %v209_v3, %s634_s24  ;;  %228 = vrot.lane.b32.xlu0 %v208_v1, %s634_s24 }
  0x50   : > { %p539_p3 = pnand %p538_p4, %p532_p11 }
  0x53   : > { %234 = vrot.lane.b32.xlu1 %v211_v2, %s634_s24  ;;  %232 = vrot.lane.b32.xlu0 %v210_v0, %s634_s24 }
  0x57   : > { %242 = vrot.lane.b32.xlu1 %v209_v3, %s635_s18  ;;  %240 = vrot.lane.b32.xlu0 %v208_v1, %s635_s18 }
  0x5b   : > { %246 = vrot.lane.b32.xlu1 %v211_v2, %s635_s18  ;;  %244 = vrot.lane.b32.xlu0 %v210_v0, %s635_s18 }
  0xb9   : > { %v221_v4 = vpop.permute.xlu1 %220  ;;  %v217_v5 = vpop.permute.xlu0 %216 }
  0xba   : > { %v253_v12 = vsel %vm252_vm0, %v208_v1, %v217_v5  ;;  %v255_v24 = vsel %vm252_vm0, %v210_v0, %v221_v4 }
  0xbd   : > { %v223_v6 = vpop.permute.xlu1 %222  ;;  %v219_v7 = vpop.permute.xlu0 %218 }
  0xbe   : > { %v254_v13 = vsel %vm252_vm0, %v209_v3, %v219_v7  ;;  %v256_v25 = vsel %vm252_vm0, %v211_v2, %v223_v6 }
  0xc1   : > { %v231_v8 = vpop.permute.xlu1 %230  ;;  %v229_v9 = vpop.permute.xlu0 %228 }
  0xc2   : > { %v259_v16 = vsel %vm257_vm1, %v254_v13, %v231_v8  ;;  %v258_v17 = vsel %vm257_vm1, %v253_v12, %v229_v9 }
  0xc5   : > { %v235_v10 = vpop.permute.xlu1 %234  ;;  %v233_v11 = vpop.permute.xlu0 %232 }
  0xc6   : > { %v261_v28 = vsel %vm257_vm1, %v256_v25, %v235_v10  ;;  %v260_v29 = vsel %vm257_vm1, %v255_v24, %v233_v11 }
  0xc9   : > { %v243_v18 = vpop.permute.xlu1 %242  ;;  %v241_v19 = vpop.permute.xlu0 %240 }
  0xca   : > { %v264_v20 = vsel %vm262_vm2, %v259_v16, %v243_v18  ;;  %v263_v21 = vsel %vm262_vm2, %v258_v17, %v241_v19 }
  0xcb   : > { %v268_v22 = vadd.f32 %v264_v20, %v205_v14  ;;  %v267_v23 = vadd.f32 %v263_v21, %v204_v15 }
  0xcd   : > { %272 = vst [vmem:[%s195_s3 + $0x8] sm:$0xff] %v268_v22  ;;  %271 = vst [vmem:[%s195_s3] sm:$0xff] %v267_v23  ;;  %v247_v30 = vpop.permute.xlu1 %246  ;;  %v245_v31 = vpop.permute.xlu0 %244 }
  0xce   : > { %v266_v32 = vsel %vm262_vm2, %v261_v28, %v247_v30  ;;  %v265_v33 = vsel %vm262_vm2, %v260_v29, %v245_v31 }
  0xcf   : > { %v270_v34 = vadd.f32 %v266_v32, %v207_v26  ;;  %v269_v35 = vadd.f32 %v265_v33, %v206_v27 }
  0xd1   : > { %274 = vst [vmem:[%s195_s3 + $0x18] sm:$0xff] %v270_v34  ;;  %273 = vst [vmem:[%s195_s3 + $0x10] sm:$0xff] %v269_v35 }
  0xd2   : > { %542 = shalt.err (!%p539_p3)
}
  0xd3   : > { %s543_s17 = scalar_lea.hbm %s822_s29, 512  ;;  %s547_s27 = scalar_lea.hbm %s878_s2, 4096 }
  0xd4   : > { %p544_p6 = scmp.ne.s32.totalorder %s822_s29, %s543_s17  ;;  %p548_p5 = scmp.lt.u32.totalorder %s822_s29, %s878_s2 }
  0xd5   : > { %p549_p10 = scmp.lt.u32.totalorder %s547_s27, %s543_s17  ;;  %p551_p8 = scmp.lt.u32.totalorder %s543_s17, %s822_s29 }
  0xd6   : > { %p545_p7 = pnand %p544_p6, %p885_p12 }
  0xd7   : > { %p550_p9 = por %p549_p10, %p548_p5 }
  0xd8   : > { %p546_p2 = pneg %p545_p7 }
  0xd9   : > { %p552_p0 = por %p551_p8, %p550_p9 }
  0xdb   : > { %p553_p11 = pnand %p552_p0, %p546_p2 }
  0xdd   : > { %556 = shalt.err (!%p553_p11)
}
  0xde   : > { %s637_s6 = smov 128   ;;  %s638_s12 = smov 512  }
  0xdf   : > { %s639_s5 = smov 8  }
  0xe0   : > { %414 = dma.vmem_to_hbm [thread:$0]  (%p885_p12), %s815_s13, 512, %s822_s29, %s276_s7, %s637_s6, %s638_s12, %s639_s5  }
  0xe1 PF: > { %p425_p13 = scmp.ge.s32.totalorder %s627_s16, 2  ;;  %s306_s22 = sand.u32 1, %s599_s9  }
  0xe2   : > { %p886_p1 = scmp.ne.s32.totalorder %s883_s28, 0  ;;  %s307_s21 = scalar_lea.sflag [#allocation4], %s306_s22 }
  0xe4   : > { %p421_p4 = pnand %p425_p13, %p886_p1 }
  0xe6   : > { %594 = dma.done.wait (!%p421_p4), %s307_s21, 512  }
  0xe7   : > { %596 = vsyncadd (!%p421_p4), %s307_s21, 4294966784  ;;  %s18_s16 = sadd.s32 1, %s627_s16   ;;  %s887_s9 = smov %s603_s10 }
  0xe8   : > { %p15_p3 = scmp.ge.s32.totalorder %s18_s16, 10   ;;  %s888_s10 = smov %s607_s11 }
  0xe9   : > { %s889_s11 = smov %s733_s30  ;;  %s890_s12 = smov %s619_s14 }
  0xea   : > { %s891_s13 = smov %s623_s15  ;;  %s892_s14 = smov %s895_s19 }
  0xeb   : > { %s893_s15 = smov %s899_s20  ;;  %17 = sbr.rel (!%p15_p3) target bundleno = 7 (0x7), region = 76 }
  0xf2   :  { %312 = vsyncpa [#allocation3], 1 }
  0xf3   :  { %314 = vsyncpa [#allocation3 + $0x1], 1 }
  0xf4   :  { %315 = vsyncpa [#allocation4], 1 }
  0xf5   :  { %317 = vsyncpa [#allocation4 + $0x1], 1 }

</bundles_post_ra>
